<compile_context>
chip_gen: v7x
topology: tpu7x:2x2x1
jax: 0.10.0
libtpu: 0.0.40
codegen_flags: <defaults>
</compile_context>

<pallas_src>
import jax
import jax.numpy as jnp
from jax.experimental import pallas as pl
from jax.experimental.pallas import tpu as pltpu


def _round_up(a: int, b: int) -> int:
    return ((a + b - 1) // b) * b


def _erf_f32(z):
    """erf via Abramowitz & Stegun 7.1.26 (|error| <= 1.5e-7), exp/VPU only."""
    a1, a2, a3, a4, a5 = (0.254829592, -0.284496736, 1.421413741,
                          -1.453152027, 1.061405429)
    p = 0.3275911
    az = jnp.abs(z)
    t = 1.0 / (1.0 + p * az)
    poly = ((((a5 * t + a4) * t + a3) * t + a2) * t + a1) * t
    e = 1.0 - poly * jnp.exp(-az * az)
    return jnp.where(z >= 0, e, -e)


def _gelu_exact(x):
    """PyTorch nn.GELU default (erf form), in f32."""
    return 0.5 * x * (1.0 + _erf_f32(x * 0.7071067811865476))


def residual_mlp_kernel(x_ref, w1_ref, b1_ref, w2_ref, b2_ref, o_ref):
    """Per row tile: out = x + (gelu(x @ W1 + b1) @ W2 + b2)."""
    x = x_ref[...]                                          # (tile_m, D), I/O dtype
    x_f32 = x.astype(jnp.float32)
    # MXU matmuls in bf16 operands, f32 accumulation.
    h = jnp.dot(x.astype(jnp.bfloat16), w1_ref[...],
                preferred_element_type=jnp.float32)         # (tile_m, H)
    h = _gelu_exact(h + b1_ref[...])                        # bias + exact GELU, f32
    y = jnp.dot(h.astype(jnp.bfloat16), w2_ref[...],
                preferred_element_type=jnp.float32)         # (tile_m, D)
    y = y + b2_ref[...]
    o_ref[...] = (y + x_f32).astype(o_ref.dtype)            # residual add in f32


def _vmem_limit_bytes() -> int:
    """~3/4 of physical VMEM: ~96 MiB on v5e/v6e, ~48 MiB on v7x."""
    try:
        cap = pltpu.get_tpu_info().vmem_capacity_bytes
    except Exception:
        cap = 64 * 1024 * 1024
    return int(min(cap * 3 // 4, 100 * 1024 * 1024))


def _pick_tile_m(M: int, D: int, H: int, x_itemsize: int, vmem_limit: int) -> int:
    """Largest row tile that fits VMEM with 2-deep buffering, but keeps >= 2 tiles."""
    sub = 16 if x_itemsize == 2 else 8          # sublane multiple (bf16 needs 16)
    resident = 2 * D * H * 2 + (H + D) * 4      # bf16 W1/W2 + f32 biases
    # Per-row working set: x + out double-buffered (I/O dtype) + f32/bf16 hidden + f32 y.
    per_row = 4 * D * x_itemsize + 6 * H + 4 * D
    budget = vmem_limit - resident - (8 << 20)  # headroom for compiler scratch
    cap = max(sub, (budget // max(per_row, 1)) // sub * sub)
    # >= 2 row tiles so both v7x TensorCores get work; cap tile length at 2048 rows.
    want = _round_up(max(-(-M // 2), sub), sub)
    return int(max(sub, min(2048, cap, want)))


def residual_add_mlp(x, w1, b1, w2, b2, *, tile_m=None):
    """x: (B, N, D). Returns fn(x) + x with fn = Linear -> GELU(exact) -> Linear."""
    B, N, D = x.shape
    H = w1.shape[1]
    M = B * N

    vmem_limit = _vmem_limit_bytes()
    if tile_m is None:
        tile_m = _pick_tile_m(M, D, H, jnp.dtype(x.dtype).itemsize, vmem_limit)

    xf = x.reshape(M, D)                      # free; D stays on the lane axis
    w1b = w1.astype(jnp.bfloat16)             # halve resident-weight DMA bytes
    w2b = w2.astype(jnp.bfloat16)
    b1f = b1.reshape(1, H).astype(jnp.float32)
    b2f = b2.reshape(1, D).astype(jnp.float32)

    grid = (pl.cdiv(M, tile_m),)              # partial last tile -> masked writes

    out = pl.pallas_call(
        residual_mlp_kernel,
        out_shape=jax.ShapeDtypeStruct((M, D), x.dtype),
        grid_spec=pltpu.PrefetchScalarGridSpec(
            num_scalar_prefetch=0,
            grid=grid,
            in_specs=[
                pl.BlockSpec((tile_m, D), lambda i: (i, 0)),  # x row tile (pipelined)
                pl.BlockSpec((D, H), lambda i: (0, 0)),       # W1 (VMEM-resident)
                pl.BlockSpec((1, H), lambda i: (0, 0)),       # b1
                pl.BlockSpec((H, D), lambda i: (0, 0)),       # W2 (VMEM-resident)
                pl.BlockSpec((1, D), lambda i: (0, 0)),       # b2
            ],
            out_specs=pl.BlockSpec((tile_m, D), lambda i: (i, 0)),
        ),
        compiler_params=pltpu.CompilerParams(
            dimension_semantics=("parallel",),        # shard row tiles across v7x TCs
            vmem_limit_bytes=vmem_limit,
        ),
        input_output_aliases={0: 0},                  # write fn(x)+x in place over x
    )(xf, w1b, b1f, w2b, b2f)

    return out.reshape(B, N, D)


if __name__ == "__main__":
    # Small shapes consistent with a transformer sub-block: batch=2, seq=8, hidden=32.
    B, N, D = 2, 8, 32
    H = 64  # MLP expansion

    key = jax.random.PRNGKey(0)
    kx, k1, k2, k3, k4 = jax.random.split(key, 5)
    x = jax.random.normal(kx, (B, N, D), dtype=jnp.float32)
    w1 = jax.random.normal(k1, (D, H), dtype=jnp.float32) * 0.05
    b1 = jax.random.normal(k2, (1, H), dtype=jnp.float32) * 0.01
    w2 = jax.random.normal(k3, (H, D), dtype=jnp.float32) * 0.05
    b2 = jax.random.normal(k4, (1, D), dtype=jnp.float32) * 0.01

    out = residual_add_mlp(x, w1, b1, w2, b2)
    jax.block_until_ready(out)

    # Reference in plain JAX (ResidualAdd semantics: fn(x) + x), exact-erf GELU
    # to match PyTorch nn.GELU's default.
    xr = x.reshape(-1, D)
    ref = jnp.dot(jax.nn.gelu(jnp.dot(xr, w1) + b1, approximate=False), w2) + b2
    ref = (ref + xr).reshape(B, N, D)
    # Tolerance accounts for bf16 MXU operands (accumulation/residual are f32).
    assert jnp.allclose(out, ref, atol=2e-2, rtol=2e-2), "mismatch vs reference"

    print("KERNEL_OK")
</pallas_src>

<mosaic_0001>
module attributes {stable_mosaic.version = 11 : i64} {
  func.func @residual_mlp_kernel(%arg0: i32, %arg1: memref<8x32xf32, #tpu.memory_space<vmem>>, %arg2: memref<32x64xbf16, #tpu.memory_space<vmem>>, %arg3: memref<1x64xf32, #tpu.memory_space<vmem>>, %arg4: memref<64x32xbf16, #tpu.memory_space<vmem>>, %arg5: memref<1x32xf32, #tpu.memory_space<vmem>>, %arg6: memref<8x32xf32, #tpu.memory_space<vmem>>) attributes {dimension_semantics = [#tpu.dimension_semantics<parallel>], iteration_bounds = array<i64: 2>, scalar_prefetch = 0 : i64, scratch_operands = 0 : i64, tpu.core_type = #tpu.core_type<tc>, window_params = [{transform_indices = @transform_0, window_bounds = array<i64: 8, 32>}, {pipeline_mode = #tpu.pipeline_mode<synchronous>, transform_indices = @transform_1, window_bounds = array<i64: 32, 64>}, {pipeline_mode = #tpu.pipeline_mode<synchronous>, transform_indices = @transform_2, window_bounds = array<i64: 1, 64>}, {pipeline_mode = #tpu.pipeline_mode<synchronous>, transform_indices = @transform_3, window_bounds = array<i64: 64, 32>}, {pipeline_mode = #tpu.pipeline_mode<synchronous>, transform_indices = @transform_4, window_bounds = array<i64: 1, 32>}, {transform_indices = @transform_5, window_bounds = array<i64: 8, 32>}]} {
    %c0 = arith.constant 0 : index
    %c0_0 = arith.constant 0 : index
    %0 = vector.load %arg1[%c0, %c0_0] : memref<8x32xf32, #tpu.memory_space<vmem>>, vector<8x32xf32>
    %1 = arith.truncf %0 : vector<8x32xf32> to vector<8x32xbf16>
    %c0_1 = arith.constant 0 : index
    %c0_2 = arith.constant 0 : index
    %2 = vector.load %arg2[%c0_1, %c0_2] : memref<32x64xbf16, #tpu.memory_space<vmem>>, vector<32x64xbf16>
    %cst = arith.constant dense<0.000000e+00> : vector<8x64xf32>
    %3 = tpu.matmul %1, %2, %cst {dimension_numbers = #tpu.dot_dimension_numbers<[1], [0], [0], [1], [0, 0, 1, 1], [], []>} : vector<8x32xbf16>, vector<32x64xbf16>, vector<8x64xf32> -> vector<8x64xf32>
    %c0_3 = arith.constant 0 : index
    %c0_4 = arith.constant 0 : index
    %4 = vector.load %arg3[%c0_3, %c0_4] : memref<1x64xf32, #tpu.memory_space<vmem>>, vector<1x64xf32>
    %5 = vector.broadcast %4 : vector<1x64xf32> to vector<8x64xf32>
    %6 = arith.addf %3, %5 : vector<8x64xf32>
    %cst_5 = arith.constant 5.000000e-01 : f32
    %7 = vector.broadcast %cst_5 : f32 to vector<8x64xf32>
    %8 = arith.mulf %7, %6 : vector<8x64xf32>
    %cst_6 = arith.constant 0.707106769 : f32
    %9 = vector.broadcast %cst_6 : f32 to vector<8x64xf32>
    %10 = arith.mulf %6, %9 : vector<8x64xf32>
    %11 = math.absf %10 : vector<8x64xf32>
    %cst_7 = arith.constant 0.327591091 : f32
    %12 = vector.broadcast %cst_7 : f32 to vector<8x64xf32>
    %13 = arith.mulf %12, %11 : vector<8x64xf32>
    %cst_8 = arith.constant 1.000000e+00 : f32
    %14 = vector.broadcast %cst_8 : f32 to vector<8x64xf32>
    %15 = arith.addf %14, %13 : vector<8x64xf32>
    %cst_9 = arith.constant 1.000000e+00 : f32
    %16 = vector.broadcast %cst_9 : f32 to vector<8x64xf32>
    %17 = arith.divf %16, %15 : vector<8x64xf32>
    %cst_10 = arith.constant 1.06140542 : f32
    %18 = vector.broadcast %cst_10 : f32 to vector<8x64xf32>
    %19 = arith.mulf %18, %17 : vector<8x64xf32>
    %cst_11 = arith.constant -1.45315206 : f32
    %20 = vector.broadcast %cst_11 : f32 to vector<8x64xf32>
    %21 = arith.addf %19, %20 : vector<8x64xf32>
    %22 = arith.mulf %21, %17 : vector<8x64xf32>
    %cst_12 = arith.constant 1.42141378 : f32
    %23 = vector.broadcast %cst_12 : f32 to vector<8x64xf32>
    %24 = arith.addf %22, %23 : vector<8x64xf32>
    %25 = arith.mulf %24, %17 : vector<8x64xf32>
    %cst_13 = arith.constant -0.284496725 : f32
    %26 = vector.broadcast %cst_13 : f32 to vector<8x64xf32>
    %27 = arith.addf %25, %26 : vector<8x64xf32>
    %28 = arith.mulf %27, %17 : vector<8x64xf32>
    %cst_14 = arith.constant 0.254829586 : f32
    %29 = vector.broadcast %cst_14 : f32 to vector<8x64xf32>
    %30 = arith.addf %28, %29 : vector<8x64xf32>
    %31 = arith.mulf %30, %17 : vector<8x64xf32>
    %cst_15 = arith.constant 0.000000e+00 : f32
    %32 = vector.broadcast %cst_15 : f32 to vector<8x64xf32>
    %33 = arith.subf %32, %11 : vector<8x64xf32>
    %34 = arith.mulf %33, %11 : vector<8x64xf32>
    %35 = math.exp %34 : vector<8x64xf32>
    %36 = arith.mulf %31, %35 : vector<8x64xf32>
    %cst_16 = arith.constant 1.000000e+00 : f32
    %37 = vector.broadcast %cst_16 : f32 to vector<8x64xf32>
    %38 = arith.subf %37, %36 : vector<8x64xf32>
    %cst_17 = arith.constant 0.000000e+00 : f32
    %39 = vector.broadcast %cst_17 : f32 to vector<8x64xf32>
    %40 = arith.cmpf oge, %10, %39 : vector<8x64xf32>
    %cst_18 = arith.constant 0.000000e+00 : f32
    %41 = vector.broadcast %cst_18 : f32 to vector<8x64xf32>
    %42 = arith.subf %41, %38 : vector<8x64xf32>
    %43 = arith.select %40, %38, %42 : vector<8x64xi1>, vector<8x64xf32>
    %cst_19 = arith.constant 1.000000e+00 : f32
    %44 = vector.broadcast %cst_19 : f32 to vector<8x64xf32>
    %45 = arith.addf %44, %43 : vector<8x64xf32>
    %46 = arith.mulf %8, %45 : vector<8x64xf32>
    %47 = arith.truncf %46 : vector<8x64xf32> to vector<8x64xbf16>
    %c0_20 = arith.constant 0 : index
    %c0_21 = arith.constant 0 : index
    %48 = vector.load %arg4[%c0_20, %c0_21] : memref<64x32xbf16, #tpu.memory_space<vmem>>, vector<64x32xbf16>
    %cst_22 = arith.constant dense<0.000000e+00> : vector<8x32xf32>
    %49 = tpu.matmul %47, %48, %cst_22 {dimension_numbers = #tpu.dot_dimension_numbers<[1], [0], [0], [1], [0, 0, 1, 1], [], []>} : vector<8x64xbf16>, vector<64x32xbf16>, vector<8x32xf32> -> vector<8x32xf32>
    %c0_23 = arith.constant 0 : index
    %c0_24 = arith.constant 0 : index
    %50 = vector.load %arg5[%c0_23, %c0_24] : memref<1x32xf32, #tpu.memory_space<vmem>>, vector<1x32xf32>
    %51 = vector.broadcast %50 : vector<1x32xf32> to vector<8x32xf32>
    %52 = arith.addf %49, %51 : vector<8x32xf32>
    %53 = arith.addf %52, %0 : vector<8x32xf32>
    %c0_25 = arith.constant 0 : index
    %c0_26 = arith.constant 0 : index
    %54 = vector.load %arg6[%c0_25, %c0_26] : memref<8x32xf32, #tpu.memory_space<vmem>>, vector<8x32xf32>
    tpu.vector_store %arg6[%c0_25, %c0_26], %53 {strides = array<i32>} : memref<8x32xf32, #tpu.memory_space<vmem>>, vector<8x32xf32>,
    return
  }
  func.func @transform_0(%arg0: i32) -> (i32, i32) {
    %c0_i32 = arith.constant 0 : i32
    %c0_i32_0 = arith.constant 0 : i32
    return %arg0, %c0_i32 : i32, i32
  }
  func.func @transform_1(%arg0: i32) -> (i32, i32) {
    %c0_i32 = arith.constant 0 : i32
    %c0_i32_0 = arith.constant 0 : i32
    %c0_i32_1 = arith.constant 0 : i32
    return %c0_i32, %c0_i32_0 : i32, i32
  }
  func.func @transform_2(%arg0: i32) -> (i32, i32) {
    %c0_i32 = arith.constant 0 : i32
    %c0_i32_0 = arith.constant 0 : i32
    %c0_i32_1 = arith.constant 0 : i32
    return %c0_i32, %c0_i32_0 : i32, i32
  }
  func.func @transform_3(%arg0: i32) -> (i32, i32) {
    %c0_i32 = arith.constant 0 : i32
    %c0_i32_0 = arith.constant 0 : i32
    %c0_i32_1 = arith.constant 0 : i32
    return %c0_i32, %c0_i32_0 : i32, i32
  }
  func.func @transform_4(%arg0: i32) -> (i32, i32) {
    %c0_i32 = arith.constant 0 : i32
    %c0_i32_0 = arith.constant 0 : i32
    %c0_i32_1 = arith.constant 0 : i32
    return %c0_i32, %c0_i32_0 : i32, i32
  }
  func.func @transform_5(%arg0: i32) -> (i32, i32) {
    %c0_i32 = arith.constant 0 : i32
    %c0_i32_0 = arith.constant 0 : i32
    return %arg0, %c0_i32 : i32, i32
  }
}

</mosaic_0001>

<bundles_post_ra>
// kernel: tpu_custom_call.1
= control target key start
LH: loop header
LB: loop body
LE: loop exit
PB: predicated region body
PF: predicated region fallthrough
CT: control target
= control target key end

     0   :  { %10 = vsyncpa [#allocation3], 0  ;;  %s938_s0 = inlined_call_operand.hbm [shape: f32[16,32], index: 0, kind: input, shape index: {}, may-alias: {0,5}]   ;;  %s939_s1 = inlined_call_operand.vmem [shape: bf16[32,64], index: 1, kind: input, shape index: {}]   ;;  %s940_s2 = inlined_call_operand.vmem [shape: f32[1,64], index: 2, kind: input, shape index: {}]   ;;  %s941_s3 = inlined_call_operand.vmem [shape: bf16[64,32], index: 3, kind: input, shape index: {}]   ;;  %s942_s4 = inlined_call_operand.vmem [shape: f32[1,32], index: 4, kind: input, shape index: {}]   ;;  %s943_s5 = inlined_call_operand.hbm [shape: f32[16,32], index: 5, kind: output, shape index: {}, may-alias: {0,5}]  }
   0x1   :  { %12 = vsyncpa [#allocation3 + $0x1], 0 }
   0x2   :  { %13 = vsyncpa [#allocation4], 0 }
   0x3   :  { %15 = vsyncpa [#allocation4 + $0x1], 0  ;;  %s747_s18 = smov 0   ;;  %s749_s19 = smov 0  }
   0x4   :  { %s751_s20 = smov 0   ;;  %s753_s21 = smov 0  }
   0x5 LB: > { %s768_s22 = sadd.s32 4294967295, %s711_s21   ;;  %s507_s23 = sadd.s32 4294967294, %s711_s21   ;;  %s711_s21 = sphi %s753_s21, %s958_s21   ;;  %s707_s20 = sphi %s751_s20, %s957_s20   ;;  %s703_s19 = sphi %s749_s19, %s956_s19   ;;  %s699_s18 = sphi %s747_s18, %s955_s18  }
   0x6   : > { %s772_s24 = sadd.s32 1, %s711_s21   ;;  %s28_s25 = sadd.s32 1, %s707_s20 }
   0x7   : > { %s25_s26 = ssub.s32 %s711_s21, %s772_s24  ;;  %p35_p0 = scmp.ne.s32.totalorder %s707_s20, %s703_s19 }
   0x8   : > { %p26_p1 = scmp.eq.s32.totalorder %s25_s26, 0  ;;  %p36_p2 = scmp.eq.s32.totalorder %s711_s21, 0 }
   0x9   : > { %p41_p3 = scmp.ne.s32.totalorder %s703_s19, %s699_s18  ;;  %p42_p4 = scmp.eq.s32.totalorder %s768_s22, 0 }
   0xa   : > { %s784_s27 = scalar_select %p26_p1, %s707_s20, %s28_s25  }
   0xb   : > { %p786_p5 = por %p36_p2, %p35_p0  ;;  %p790_p6 = por %p42_p4, %p41_p3 }
   0xc   : > { %p149_p7 = scmp.eq.s32.totalorder %s768_s22, 1  ;;  %p155_p8 = scmp.eq.s32.totalorder %s507_s23, 1 }
   0xd   : > { %p569_p10 = scmp.lt.s32.totalorder %s711_s21, 2  ;;  %s187_s7 = sand.u32 1, %s707_s20  }
   0xe   : > { %p797_p11 = por %p149_p7, %p35_p0  ;;  %p801_p12 = por %p155_p8, %p41_p3 }
   0xf   : > { %s511_s8 = sshll.u32 %s711_s21, 7  ;;  %s510_s9 = sshll.u32 %s187_s7, 3 }
  0x10   : > { %s947_s30 = scalar_select %p797_p11, 1, 0 }
  0x11   : > { %s948_s6 = scalar_select %p801_p12, 1, 0 }
  0x12   : > { %s810_s12 = scalar_lea.hbm %s938_s0, %s511_s8  ;;  %s191_s13 = scalar_lea.vmem [#allocation2], %s510_s9 }
  0x13   : > { %s198_s14 = sshll.u32 %s191_s13, 4  ;;  %p814_p13 = pnand %p569_p10, %p786_p5  ;;  %s818_s14 = int_to_ptr.vmem [resolvable:$true] %s198_s14 }
  0x14   : > { %s188_s16 = scalar_lea.sflag [#allocation3], %s187_s7  ;;  %s615_s17 = scalar_lea.hbm %s810_s12, 128 }
  0x15   : > { %p616_p2 = scmp.ne.s32.totalorder %s810_s12, %s615_s17  ;;  %p617_p3 = pneg %p814_p13 }
  0x16   : > { %s620_s26 = scalar_lea.hbm %s938_s0, 256  ;;  %p621_p5 = scmp.lt.u32.totalorder %s810_s12, %s938_s0 }
  0x17   : > { %p618_p4 = pnand %p617_p3, %p616_p2  ;;  %p622_p8 = scmp.lt.u32.totalorder %s620_s26, %s615_s17 }
  0x18   : > { %p624_p9 = scmp.lt.u32.totalorder %s615_s17, %s810_s12 }
  0x19   : > { %p619_p7 = pneg %p618_p4  ;;  %p623_p10 = por %p622_p8, %p621_p5 }
  0x1b   : > { %p625_p0 = por %p624_p9, %p623_p10 }
  0x1d   : > { %p626_p1 = pnand %p625_p0, %p619_p7 }
  0x1f   : > { %629 = shalt.err (!%p626_p1)
}
  0x20   : > { %s630_s7 = scalar_lea.vmem %s818_s14, 128  ;;  %s713_s9 = smov [#allocation2]  }
  0x21   : > { %p631_p2 = scmp.ne.s32.totalorder %s818_s14, %s630_s7  ;;  %s635_s10 = sshll.u32 %s713_s9, 4  ;;  %s636_s10 = int_to_ptr.vmem [resolvable:$false] %s635_s10 }
  0x22   : > { %s637_s11 = scalar_lea.vmem %s636_s10, 256  ;;  %p638_p11 = scmp.lt.s32.totalorder %s818_s14, %s636_s10 }
  0x23   : > { %p633_p4 = pnand %p631_p2, %p617_p3  ;;  %p639_p5 = scmp.lt.s32.totalorder %s637_s11, %s630_s7 }
  0x25   : > { %p634_p12 = pneg %p633_p4  ;;  %p640_p8 = por %p639_p5, %p638_p11 }
  0x27   : > { %p641_p9 = pnand %p640_p8, %p634_p12 }
  0x29   : > { %644 = shalt.err (!%p641_p9)
}
  0x2a   : > { %564 = dma.hbm_to_vmem [thread:$0]  (!%p814_p13), %s810_s12, 128, %s818_s14, %s188_s16  }
  0x2b   : > { %p950_p0 = scmp.lt.s32.totalorder %s711_s21, 3  ;;  %p951_p1 = scmp.ge.s32.totalorder %s711_s21, 1 }
  0x2d   : > { %p204_p3 = pnand %p951_p1, %p950_p0 }
  0x2e   : > { %s852_s13 = sand.u32 (!%p204_p3), 1, %s703_s19  }
  0x2f   : > { %207 = sbr.rel (%p204_p3) target bundleno = 559 (0x22f), region = 40  ;;  %s513_s17 = sshll.u32 (!%p204_p3), %s852_s13, 3 }
  0x30   : > { %s210_s23 = scalar_lea.sflag (!%p204_p3), [#allocation3], %s852_s13  ;;  %s213_s15 = scalar_lea.vmem (!%p204_p3), [#allocation2], %s513_s17 }
  0x36   : > { %690 = dma.done.wait (%p790_p6), %s210_s23, 128  }
  0x37   : > { %692 = vsyncadd (%p790_p6), %s210_s23, 4294967168  ;;  %v714_v0 = vmov 0.0   ;;  %vm715_vm0 = vmmov 0   ;;  %v605_v1 = vld [vmem:[%s939_s1] sm:$0xff]   ;;  %v606_v2 = vld [vmem:[%s939_s1 + $0x8] sm:$0xff]   ;;  %vm266_vm1 = vcmask 261120  }
  0x38   : > { %537 = vmatprep.subr.bf16.mxu0 %v714_v0  ;;  %541 = vmatprep.mubr.msk.bf16.mxu0 %vm715_vm0, %v714_v0  ;;  %v241_v3 = vld [vmem:[%s213_s15] sm:$0xff]  ;;  %v609_v7 = vld [vmem:[%s941_s3 + $0x10] sm:$0xff]   ;;  %v610_v8 = vld [vmem:[%s941_s3 + $0x18] sm:$0xff]   ;;  %vm377_vm3 = vcmask 523264   ;;  %s526_s16 = sshll.u32 %s768_s22, 7  ;;  %s239_s25 = scalar_lea.vmem [#allocation5], %s513_s17 }
  0x39   : > { %545 = vmatprep.subr.bf16.mxu1 %v714_v0  ;;  %553 = vmatprep.mubr.msk.bf16.mxu1 %vm715_vm0, %v714_v0  ;;  %v242_v4 = vpack.c.bf16 %v241_v3, %v241_v3  ;;  %v607_v5 = vld [vmem:[%s941_s3] sm:$0xff]   ;;  %v608_v6 = vld [vmem:[%s941_s3 + $0x8] sm:$0xff]   ;;  %s437_s29 = sshll.u32 %s239_s25, 4  ;;  %s893_s8 = scalar_lea.hbm %s943_s5, %s526_s16  ;;  %s895_s29 = int_to_ptr.vmem [resolvable:$true] %s437_s29 }
  0x3a   : > { %538 = vmatpush3.bf16.msra.mxu0 %v605_v1  ;;  %546 = vmatpush3.bf16.msra.mxu1 %v607_v5  ;;  %v515_v9 = vld [vmem:[%s940_s2] ss:$0 sm:$0xff]  ;;  %s424_s22 = scalar_lea.sflag [#allocation4], %s852_s13  ;;  %s645_s17 = scalar_lea.vmem %s895_s29, 128 }
  0x3b   : > { %539 = vmatprep.subr.bf16.mxu0 %v714_v0  ;;  %547 = vmatprep.subr.bf16.mxu1 %v714_v0  ;;  %v519_v41 = vld [vmem:[%s942_s4] ss:$0 sm:$0xff]  ;;  %p646_p6 = scmp.ne.s32.totalorder %s895_s29, %s645_s17  ;;  %p952_p11 = scmp.ne.s32.totalorder %s947_s30, 0 }
  0x3c   : > { %s716_s7 = smov [#allocation5]  }
  0x3d   : > { %p647_p12 = pnand %p646_p6, %p952_p11  ;;  %s649_s9 = sshll.u32 %s716_s7, 4  ;;  %s650_s9 = int_to_ptr.vmem [resolvable:$false] %s649_s9 }
  0x3e   : > { %540 = vmatpush3.bf16.msra.mxu0 %v606_v2  ;;  %548 = vmatpush3.bf16.msra.mxu1 %v608_v6  ;;  %s651_s10 = scalar_lea.vmem %s650_s9, 256  ;;  %p652_p7 = scmp.lt.s32.totalorder %s895_s29, %s650_s9 }
  0x3f   : > { %549 = vmatprep.subr.bf16.mxu1 %v714_v0  ;;  %p648_p13 = pneg %p647_p12  ;;  %p653_p10 = scmp.lt.s32.totalorder %s651_s10, %s645_s17 }
  0x41   : > { %542 = vmatmul.mubr.msk.bf16.vlgmr.msra.gmra.mrb[0].mxu0 %vm266_vm1, %v242_v4  ;;  %p654_p2 = por %p653_p10, %p652_p7 }
  0x42   : > { %550 = vmatpush3.bf16.msra.mxu1 %v609_v7 }
  0x43   : > { %551 = vmatprep.subr.bf16.mxu1 %v714_v0  ;;  %p655_p4 = pnand %p654_p2, %p648_p13 }
  0x46   : > { %552 = vmatpush3.bf16.msra.mxu1 %v610_v8 }
 0x114   : > { %v304_v10 = vpop.f32.mrb[0].mxu0 }
 0x115   : > { %v305_v11 = vadd.f32 %v515_v9, %v304_v10  ;;  %v543_v12 = vpop.f32.mrb[1].mxu0 }
 0x116   : > { %v307_v13 = vpop.f32.mrb[2].mxu0 }
 0x117   : > { %v311_v14 = vmul.f32 0.70710677, %v305_v11  ;;  %v544_v15 = vpop.f32.mrb[3].mxu0  ;;  %v310_v37 = vmul.f32 0.5, %v305_v11 }
 0x119   : > { %v312_v16 = vand.u32 2147483647, %v311_v14  ;;  %vm332_vm2 = vcmp.ge.f32.partialorder %v311_v14, 0.0 }
 0x11b   : > { %v313_v17 = vmul.f32 0.3275911, %v312_v16  ;;  %v326_v19 = vsub.f32 0.0, %v312_v16 }
 0x11d   : > { %v314_v18 = vadd.f32 1.0, %v313_v17  ;;  %v327_v21 = vmul.f32 %v326_v19, %v312_v16 }
 0x11f   : > { %611 = vrcp.f32 %v314_v18  ;;  %v328_v24 = vmul.f32 1.442695, %v327_v21 }
 0x121   : > { %613 = vpow2.f32 %v328_v24 }
 0x129   : > { %v612_v20 = vpop.eup %611 }
 0x12a   : > { %v317_v22 = vmul.f32 1.0614054, %v612_v20 }
 0x12b   : > { %v614_v32 = vpop.eup %613 }
 0x12c   : > { %v318_v23 = vadd.f32 -1.4531521, %v317_v22 }
 0x12e   : > { %v319_v25 = vmul.f32 %v612_v20, %v318_v23 }
 0x130   : > { %v320_v26 = vadd.f32 1.4214138, %v319_v25 }
 0x132   : > { %v321_v27 = vmul.f32 %v612_v20, %v320_v26 }
 0x134   : > { %v322_v28 = vadd.f32 -0.28449672, %v321_v27 }
 0x136   : > { %v323_v29 = vmul.f32 %v612_v20, %v322_v28 }
 0x138   : > { %v324_v30 = vadd.f32 0.2548296, %v323_v29 }
 0x13a   : > { %v325_v31 = vmul.f32 %v612_v20, %v324_v30 }
 0x13c   : > { %v330_v33 = vmul.f32 %v614_v32, %v325_v31 }
 0x13e   : > { %v331_v34 = vsub.f32 1.0, %v330_v33 }
 0x140   : > { %v333_v35 = vsub.f32 0.0, %v331_v34 }
 0x142   : > { %v334_v36 = vsel %vm332_vm2, %v331_v34, %v333_v35 }
 0x143   : > { %v335_v38 = vadd.f32 1.0, %v334_v36 }
 0x145   : > { %v336_v39 = vmul.f32 %v335_v38, %v310_v37 }
 0x147   : > { %v337_v40 = vpack.c.bf16 %v336_v39, %v336_v39 }
 0x149   : > { %554 = vmatmul.mubr.msk.bf16.vlgmr.msra.gmra.mrb[0].mxu1 %vm377_vm3, %v337_v40 }
 0x21c   : > { %v415_v42 = vpop.f32.mrb[0].mxu1 }
 0x21d   : > { %v416_v43 = vadd.f32 %v519_v41, %v415_v42  ;;  %v555_v44 = vpop.f32.mrb[1].mxu1 }
 0x21e   : > { %v418_v45 = vpop.f32.mrb[2].mxu1 }
 0x21f   : > { %v421_v46 = vadd.f32 %v416_v43, %v241_v3  ;;  %v556_v47 = vpop.f32.mrb[3].mxu1 }
 0x221   : > { %422 = vst.msk [vmem:[%s239_s25] sm:$0xff] %vm266_vm1, %v421_v46 }
 0x222   : > { %658 = shalt.err (!%p655_p4)
}
 0x223   : > { %s659_s13 = scalar_lea.hbm %s893_s8, 128  ;;  %s663_s15 = scalar_lea.hbm %s943_s5, 256 }
 0x224   : > { %p660_p5 = scmp.ne.s32.totalorder %s893_s8, %s659_s13  ;;  %p664_p0 = scmp.lt.u32.totalorder %s893_s8, %s943_s5 }
 0x225   : > { %p665_p1 = scmp.lt.u32.totalorder %s663_s15, %s659_s13  ;;  %p667_p6 = scmp.lt.u32.totalorder %s659_s13, %s893_s8 }
 0x226   : > { %p661_p8 = pnand %p660_p5, %p952_p11 }
 0x227   : > { %p666_p3 = por %p665_p1, %p664_p0 }
 0x228   : > { %p662_p9 = pneg %p661_p8 }
 0x229   : > { %p668_p12 = por %p667_p6, %p666_p3 }
 0x22b   : > { %p669_p13 = pnand %p668_p12, %p662_p9 }
 0x22d   : > { %672 = shalt.err (!%p669_p13)
}
 0x22e   : > { %559 = dma.vmem_to_hbm [thread:$0]  (%p952_p11), %s895_s29, 128, %s893_s8, %s424_s22  }
 0x22f PF: > { %s449_s16 = sand.u32 1, %s699_s18   ;;  %p953_p7 = scmp.ne.s32.totalorder %s948_s6, 0 }
 0x230   : > { %p954_p10 = scmp.ge.s32.totalorder %s711_s21, 2  ;;  %s450_s25 = scalar_lea.sflag [#allocation4], %s449_s16 }
 0x232   : > { %p566_p2 = pnand %p954_p10, %p953_p7 }
 0x234   : > { %694 = dma.done.wait (!%p566_p2), %s450_s25, 128  }
 0x235   : > { %696 = vsyncadd (!%p566_p2), %s450_s25, 4294967168  ;;  %p18_p4 = scmp.ge.s32.totalorder %s772_s24, 4   ;;  %s955_s18 = smov %s703_s19 }
 0x236   : > { %s956_s19 = smov %s707_s20  ;;  %s957_s20 = smov %s784_s27 }
 0x237   : > { %s958_s21 = smov %s772_s24  ;;  %20 = sbr.rel (!%p18_p4) target bundleno = 5 (0x5), region = 85 }
 0x23e   :  { %455 = vsyncpa [#allocation3], 1 }
 0x23f   :  { %457 = vsyncpa [#allocation3 + $0x1], 1 }
 0x240   :  { %458 = vsyncpa [#allocation4], 1 }
 0x241   :  { %460 = vsyncpa [#allocation4 + $0x1], 1 }

</bundles_post_ra>
